<compile_context>
chip_gen: v7x
topology: tpu7x:2x2x1
jax: 0.10.0
libtpu: 0.0.40
codegen_flags: <defaults>
</compile_context>

<pallas_src>
from typing import NamedTuple

import jax
import jax.numpy as jnp
from jax.experimental import pallas as pl
from jax.experimental.pallas import tpu as pltpu


_VMEM_TILE_BUDGET = 24 * 1024 * 1024   # double-buffered working-set cap (v7x-safe)
_XLA_FALLBACK_FLOPS = 128 * 128 * 128  # below this, pallas launch overhead dominates


def _round_up(x, m):
    return ((x + m - 1) // m) * m


def _divisor_tile(total, requested):
    """Largest divisor of `total` that is a multiple of 256 (preferred, v6e/v7x MXU)
    or 128 (lane width / v5e MXU) and <= requested; falls back to 128."""
    for align in (256, 128):
        if total % align != 0:
            continue
        units = total // align
        fits = [align * d for d in range(1, units + 1)
                if units % d == 0 and align * d <= requested]
        if fits:
            return max(fits)
    return 128 if total % 128 == 0 else total


# ----------------------------------------------------------------------------- kernels

def _mm_kernel_accum_out(x_ref, w_ref, o_ref):
    # f32 output block is resident across the K ("arbitrary") axis -> accumulate
    # directly into it; no separate scratch accumulator needed.
    @pl.when(pl.program_id(2) == 0)
    def _():
        o_ref[...] = jnp.zeros_like(o_ref)

    o_ref[...] += jnp.dot(x_ref[...], w_ref[...],
                          preferred_element_type=jnp.float32)


def _mm_kernel_acc_scratch(x_ref, w_ref, o_ref, acc_ref):
    # Used only when the output dtype is narrower than f32 (keep f32 accumulation).
    @pl.when(pl.program_id(2) == 0)
    def _():
        acc_ref[...] = jnp.zeros_like(acc_ref)

    acc_ref[...] += jnp.dot(x_ref[...], w_ref[...],
                            preferred_element_type=jnp.float32)

    @pl.when(pl.program_id(2) == pl.num_programs(2) - 1)
    def _():
        o_ref[...] = acc_ref[...].astype(o_ref.dtype)


# ----------------------------------------------------------------------- weight packing

class PackedWeight(NamedTuple):
    w_kn: jax.Array        # (K_pad, N_pad) bf16: concat'd, transposed, padded
    in_features: int
    out_features: int


def pack_weights(w_stacked):
    """One-time weight prep: fold the split-concat (free reshape), transpose to
    (K, N) so the kernel runs x @ W with no in-kernel transpose, cast to bf16,
    and pad to lane/sublane-friendly sizes.  Do this at init, not per call."""
    split_size, n_chunk, K = w_stacked.shape
    N = split_size * n_chunk
    w_kn = jnp.transpose(w_stacked.reshape(N, K), (1, 0)).astype(jnp.bfloat16)
    # K >= 128: pad to a 128 multiple (x lane dim needs it when K is tiled).
    # K < 128: keep it as the full (single-step) dim, just 16-align for bf16 sublanes.
    K_pad = _round_up(K, 128) if K >= 128 else _round_up(K, 16)
    N_pad = _round_up(N, 128)
    if (K_pad, N_pad) != (K, N):
        w_kn = jnp.pad(w_kn, ((0, K_pad - K), (0, N_pad - N)))
    return PackedWeight(w_kn=w_kn, in_features=K, out_features=N)


# ------------------------------------------------------------------------------ wrapper

def model_parallel_linear(x, weights, *, tb=512, tn=1024, tk=1024,
                          out_dtype=jnp.float32, allow_xla_fallback=True,
                          w_buffer_count=2):
    """y = x @ concat_i(W_i).T  (bias-free column-parallel linear).

    x:        (B, in_features) float32
    weights:  PackedWeight (preferred, pre-packed once) or raw
              (split_size, out_chunk, in_features) float32 stacked weights.
    returns:  (B, out_features) in `out_dtype`.
    """
    packed = weights if isinstance(weights, PackedWeight) else pack_weights(weights)
    B, K = x.shape
    assert K == packed.in_features, "in_features mismatch"
    N = packed.out_features
    K_pad, N_pad = packed.w_kn.shape

    # Small-problem fast path: grid-step (~0.35us) + launch overhead dominates and
    # K-padding wastes MXU work; let XLA handle it.
    if allow_xla_fallback and B * K * N <= _XLA_FALLBACK_FLOPS:
        y = jnp.dot(x.astype(jnp.bfloat16), packed.w_kn[:K, :N],
                    preferred_element_type=jnp.float32)
        return y.astype(out_dtype)

    out_bytes = jnp.dtype(out_dtype).itemsize
    use_acc = jnp.dtype(out_dtype) != jnp.dtype(jnp.float32)
    w_bufs = max(2, int(w_buffer_count))
    k_single = (K_pad % 128 != 0)   # small-K case: single K step, tk == full dim

    # Tile selection: tb multiple of 16 (bf16 sublane packing), tn/tk divisors of
    # the padded dims (prefer 256 multiples) so nothing is over-padded.
    tb_eff = _round_up(max(16, min(tb, _round_up(B, 16))), 16)
    tn_eff = _divisor_tile(N_pad, tn)
    tk_eff = K_pad if k_single else _divisor_tile(K_pad, tk)

    # v7x has 2 TensorCores sharded over the "parallel" axes: if both parallel axes
    # would collapse to one block (small B), halve tn so both cores get work.
    if _round_up(B, tb_eff) // tb_eff == 1 and N_pad // tn_eff == 1 and N_pad >= 256:
        tn_eff = _divisor_tile(N_pad, N_pad // 2)

    # Clamp the double-buffered working set (v7x: 64 MiB physical VMEM).
    def ws(tb_, tn_, tk_):
        return (2 * tb_ * tk_ * 2                    # x tiles (bf16, double-buffered)
                + w_bufs * tk_ * tn_ * 2             # w tiles (bf16)
                + 2 * tb_ * tn_ * out_bytes          # out tiles
                + (tb_ * tn_ * 4 if use_acc else 0)) # optional f32 acc scratch

    for _ in range(16):
        if ws(tb_eff, tn_eff, tk_eff) <= _VMEM_TILE_BUDGET:
            break
        if tn_eff > 128:
            tn_eff = _divisor_tile(N_pad, tn_eff // 2)
        elif not k_single and tk_eff > 128:
            tk_eff = _divisor_tile(K_pad, tk_eff // 2)
        elif tb_eff > 16:
            tb_eff = _round_up(max(16, tb_eff // 2), 16)
        else:
            break

    B_pad = _round_up(B, tb_eff)

    # Only the activation is touched per call; zero K-padding is exact for matmul.
    x_bf = x.astype(jnp.bfloat16)
    if (B_pad, K_pad) != (B, K):
        x_bf = jnp.pad(x_bf, ((0, B_pad - B), (0, K_pad - K)))

    grid = (B_pad // tb_eff, N_pad // tn_eff, K_pad // tk_eff)

    w_spec_kwargs = {}
    if w_bufs > 2:
        # Deeper buffering on the weight stream if weight DMA is exposed.
        w_spec_kwargs["pipeline_mode"] = pl.Buffered(w_bufs)

    in_specs = [
        pl.BlockSpec((tb_eff, tk_eff), lambda i, j, k: (i, k)),
        pl.BlockSpec((tk_eff, tn_eff), lambda i, j, k: (k, j), **w_spec_kwargs),
    ]
    out_spec = pl.BlockSpec((tb_eff, tn_eff), lambda i, j, k: (i, j))

    if use_acc:
        kernel = _mm_kernel_acc_scratch
        scratch = (pltpu.VMEM((tb_eff, tn_eff), jnp.float32),)
    else:
        kernel = _mm_kernel_accum_out
        scratch = ()

    # Raise the scoped VMEM limit (v5e default is 16 MiB); stay below v7x's 64 MiB.
    vmem_limit = int(min(max(32 << 20, 2 * ws(tb_eff, tn_eff, tk_eff)), 48 << 20))

    y_pad = pl.pallas_call(
        kernel,
        out_shape=jax.ShapeDtypeStruct((B_pad, N_pad), out_dtype),
        grid_spec=pltpu.PrefetchScalarGridSpec(
            num_scalar_prefetch=0,
            grid=grid,
            in_specs=in_specs,
            out_specs=out_spec,
            scratch_shapes=scratch,
        ),
        compiler_params=pltpu.CompilerParams(
            dimension_semantics=("parallel", "parallel", "arbitrary"),
            vmem_limit_bytes=vmem_limit,
        ),
    )(x_bf, packed.w_kn)

    return y_pad[:B, :N]


def init_split_weights(key, in_features, out_features, split_size):
    """Deterministic per-split weights, mimicking nn.Linear's U(-1/sqrt(in), 1/sqrt(in))."""
    assert out_features % split_size == 0
    n_chunk = out_features // split_size
    bound = 1.0 / jnp.sqrt(jnp.float32(in_features))
    keys = jax.random.split(key, split_size)
    ws = [
        jax.random.uniform(
            k, (n_chunk, in_features), dtype=jnp.float32, minval=-bound, maxval=bound
        )
        for k in keys
    ]
    return jnp.stack(ws, axis=0)  # (split_size, n_chunk, in_features)


if __name__ == "__main__":
    key = jax.random.PRNGKey(0)
    kx1, kw1, kx2, kw2 = jax.random.split(key, 4)

    # ---- Test A: the module's natural small shape (batch=8, in=32, out=256, 2 splits).
    #      Force the Pallas kernel (the fast path would otherwise dispatch to XLA).
    B1, K1, N1, S1 = 8, 32, 256, 2
    x1 = jax.random.normal(kx1, (B1, K1), dtype=jnp.float32)
    w1 = init_split_weights(kw1, K1, N1, S1)
    packed1 = pack_weights(w1)                       # hoisted one-time weight prep
    y1 = jax.block_until_ready(
        model_parallel_linear(x1, packed1, allow_xla_fallback=False))

    w1_full = w1.reshape(N1, K1)
    y1_ref_f32 = x1 @ w1_full.T
    y1_ref_bf16 = jnp.dot(x1.astype(jnp.bfloat16), w1_full.T.astype(jnp.bfloat16),
                          preferred_element_type=jnp.float32)
    assert y1.shape == (B1, N1)
    assert jnp.allclose(y1, y1_ref_bf16, atol=2e-3, rtol=2e-3)
    assert jnp.allclose(y1, y1_ref_f32, atol=2e-2, rtol=2e-2)

    # ---- Test B: larger shape exercising the K-accumulation loop, divisor tiling of
    #      ragged N (1152 -> tn=384) and the pre-packed weight path.
    B2, K2, N2, S2 = 192, 2304, 1152, 3
    x2 = jax.random.normal(kx2, (B2, K2), dtype=jnp.float32)
    w2 = init_split_weights(kw2, K2, N2, S2)
    packed2 = pack_weights(w2)
    y2 = jax.block_until_ready(model_parallel_linear(x2, packed2))

    w2_full = w2.reshape(N2, K2)
    y2_ref_f32 = x2 @ w2_full.T
    y2_ref_bf16 = jnp.dot(x2.astype(jnp.bfloat16), w2_full.T.astype(jnp.bfloat16),
                          preferred_element_type=jnp.float32)
    assert y2.shape == (B2, N2)
    assert jnp.allclose(y2, y2_ref_bf16, atol=2e-3, rtol=2e-3)
    assert jnp.allclose(y2, y2_ref_f32, atol=2e-2, rtol=2e-2)

    print("KERNEL_OK")
</pallas_src>

<mosaic_0001>
module attributes {stable_mosaic.version = 11 : i64} {
  func.func @_mm_kernel_accum_out(%arg0: i32, %arg1: i32, %arg2: i32, %arg3: memref<16x32xbf16, #tpu.memory_space<vmem>>, %arg4: memref<32x128xbf16, #tpu.memory_space<vmem>>, %arg5: memref<16x128xf32, #tpu.memory_space<vmem>>) attributes {dimension_semantics = [#tpu.dimension_semantics<parallel>, #tpu.dimension_semantics<parallel>, #tpu.dimension_semantics<arbitrary>], iteration_bounds = array<i64: 1, 2, 1>, scalar_prefetch = 0 : i64, scratch_operands = 0 : i64, tpu.core_type = #tpu.core_type<tc>, window_params = [{transform_indices = @transform_0, window_bounds = array<i64: 16, 32>}, {transform_indices = @transform_1, window_bounds = array<i64: 32, 128>}, {transform_indices = @transform_2, window_bounds = array<i64: 16, 128>}]} {
    %c0_i32 = arith.constant 0 : i32
    %0 = arith.cmpi eq, %arg2, %c0_i32 : i32
    %1 = arith.extui %0 : i1 to i32
    %c0_i32_0 = arith.constant 0 : i32
    %2 = arith.cmpi ne, %1, %c0_i32_0 : i32
    scf.if %2 {
      %cst_8 = arith.constant 0.000000e+00 : f32
      %9 = vector.broadcast %cst_8 : f32 to vector<16x128xf32>
      %c0_9 = arith.constant 0 : index
      %c0_10 = arith.constant 0 : index
      %10 = vector.load %arg5[%c0_9, %c0_10] : memref<16x128xf32, #tpu.memory_space<vmem>>, vector<16x128xf32>
      tpu.vector_store %arg5[%c0_9, %c0_10], %9 {strides = array<i32>} : memref<16x128xf32, #tpu.memory_space<vmem>>, vector<16x128xf32>,
    } else {
    }
    %c0 = arith.constant 0 : index
    %c0_1 = arith.constant 0 : index
    %3 = vector.load %arg5[%c0, %c0_1] : memref<16x128xf32, #tpu.memory_space<vmem>>, vector<16x128xf32>
    %c0_2 = arith.constant 0 : index
    %c0_3 = arith.constant 0 : index
    %4 = vector.load %arg3[%c0_2, %c0_3] : memref<16x32xbf16, #tpu.memory_space<vmem>>, vector<16x32xbf16>
    %c0_4 = arith.constant 0 : index
    %c0_5 = arith.constant 0 : index
    %5 = vector.load %arg4[%c0_4, %c0_5] : memref<32x128xbf16, #tpu.memory_space<vmem>>, vector<32x128xbf16>
    %cst = arith.constant dense<0.000000e+00> : vector<16x128xf32>
    %6 = tpu.matmul %4, %5, %cst {dimension_numbers = #tpu.dot_dimension_numbers<[1], [0], [0], [1], [0, 0, 1, 1], [], []>} : vector<16x32xbf16>, vector<32x128xbf16>, vector<16x128xf32> -> vector<16x128xf32>
    %7 = arith.addf %3, %6 : vector<16x128xf32>
    %c0_6 = arith.constant 0 : index
    %c0_7 = arith.constant 0 : index
    %8 = vector.load %arg5[%c0_6, %c0_7] : memref<16x128xf32, #tpu.memory_space<vmem>>, vector<16x128xf32>
    tpu.vector_store %arg5[%c0_6, %c0_7], %7 {strides = array<i32>} : memref<16x128xf32, #tpu.memory_space<vmem>>, vector<16x128xf32>,
    return
  }
  func.func @transform_0(%arg0: i32, %arg1: i32, %arg2: i32) -> (i32, i32) {
    %c0_i32 = arith.constant 0 : i32
    return %arg0, %arg2 : i32, i32
  }
  func.func @transform_1(%arg0: i32, %arg1: i32, %arg2: i32) -> (i32, i32) {
    %c0_i32 = arith.constant 0 : i32
    return %arg2, %arg1 : i32, i32
  }
  func.func @transform_2(%arg0: i32, %arg1: i32, %arg2: i32) -> (i32, i32) {
    %c0_i32 = arith.constant 0 : i32
    return %arg0, %arg1 : i32, i32
  }
}

</mosaic_0001>

<bundles_post_ra>
// kernel: tpu_custom_call.1
= control target key start
LH: loop header
LB: loop body
LE: loop exit
PB: predicated region body
PF: predicated region fallthrough
CT: control target
= control target key end

     0   :  { %7 = vsyncpa [#allocation3], 0  ;;  %s928_s0 = inlined_call_operand.hbm [shape: bf16[16,32], index: 0, kind: input, shape index: {}]   ;;  %s929_s1 = inlined_call_operand.hbm [shape: bf16[32,256], index: 1, kind: input, shape index: {}]   ;;  %s930_s2 = inlined_call_operand.hbm [shape: f32[16,256], index: 2, kind: output, shape index: {}]  }
   0x1   :  { %8 = vsyncpa [#allocation6], 0 }
   0x2   :  { %10 = vsyncpa [#allocation6 + $0x1], 0 }
   0x3   :  { %11 = vsyncpa [#allocation4], 0 }
   0x4   :  { %13 = vsyncpa [#allocation4 + $0x1], 0  ;;  %s703_s9 = smov 0   ;;  %s705_s10 = smov 0  }
   0x5   :  { %s707_s11 = smov 0   ;;  %s709_s12 = smov 0  }
   0x6   :  { %s711_s13 = smov 0   ;;  %s713_s14 = smov 0  }
   0x7 LB: > { %s417_s15 = sadd.s32 4294967295, %s675_s14   ;;  %s418_s16 = sadd.s32 4294967294, %s675_s14   ;;  %s675_s14 = sphi %s713_s14, %s19_s14   ;;  %s671_s13 = sphi %s711_s13, %s956_s13   ;;  %s667_s12 = sphi %s709_s12, %s955_s12   ;;  %s663_s11 = sphi %s707_s11, %s954_s11   ;;  %s659_s10 = sphi %s705_s10, %s953_s10   ;;  %s655_s9 = sphi %s703_s9, %s952_s9  }
   0x8   : > { %p82_p0 = scmp.ne.s32.totalorder %s663_s11, %s659_s10  ;;  %p83_p1 = scmp.eq.s32.totalorder %s675_s14, 0 }
   0x9   : > { %p88_p2 = scmp.ne.s32.totalorder %s659_s10, %s655_s9  ;;  %p740_p3 = scmp.eq.s32.totalorder %s417_s15, 0 }
   0xa   : > { %p744_p4 = por %p83_p1, %p82_p0  ;;  %p114_p5 = scmp.eq.s32.totalorder %s417_s15, 1 }
   0xb   : > { %s937_s17 = scalar_select %p740_p3, 1, 0 }
   0xc   : > { %p750_p6 = por %p740_p3, %p88_p2  ;;  %p120_p7 = scmp.eq.s32.totalorder %s418_s16, 1 }
   0xd   : > { %p754_p8 = por %p114_p5, %p82_p0  ;;  %p419_p9 = scmp.ge.s32.totalorder %s675_s14, 1 }
   0xe   : > { %s939_s19 = scalar_select %p750_p6, 1, 0 }
   0xf   : > { %s940_s20 = scalar_select %p754_p8, 1, 0 }
  0x10   : > { %p759_p10 = por %p120_p7, %p88_p2  ;;  %p127_p11 = scmp.lt.s32.totalorder %s675_s14, 3 }
  0x11   : > { %s677_s23 = smov [#allocation2]   ;;  %p468_p1 = scmp.lt.s32.totalorder %s675_s14, 2 }
  0x12   : > { %s941_s21 = scalar_select %p759_p10, 1, 0 }
  0x13   : > { %p764_p12 = pnand %p419_p9, %p127_p11  ;;  %s143_s24 = sshll.u32 %s677_s23, 4  ;;  %s768_s24 = int_to_ptr.vmem [resolvable:$true] %s143_s24 }
  0x14   : > { %p782_p2 = pnand %p468_p1, %p744_p4  ;;  %s34_s27 = sadd.s32 1, %s671_s13 }
  0x15   : > { %s942_s22 = scalar_select %p764_p12, 1, 0 }
  0x16   : > { %p455_p13 = pneg %p764_p12  ;;  %s531_s30 = scalar_lea.hbm %s928_s0, 128 }
  0x17   : > { %s944_s26 = scalar_select %p782_p2, 1, 0 }
  0x18   : > { %p776_p5 = pnand %p455_p13, %p740_p3  ;;  %p532_p7 = scmp.ne.s32.totalorder %s928_s0, %s531_s30 }
  0x19   : > { %p538_p4 = scmp.lt.u32.totalorder %s531_s30, %s928_s0 }
  0x1a   : > { %p533_p9 = pneg %p776_p5 }
  0x1c   : > { %p534_p11 = pnand %p533_p9, %p532_p7 }
  0x1e   : > { %p535_p13 = pneg %p534_p11 }
  0x20   : > { %p540_p1 = pnand %p538_p4, %p535_p13 }
  0x22   : > { %543 = shalt.err (!%p540_p1)
}
  0x23   : > { %s544_s7 = scalar_lea.vmem %s768_s24, 128  ;;  %p552_p6 = scmp.lt.s32.totalorder %s768_s24, %s768_s24 }
  0x24   : > { %p545_p0 = scmp.ne.s32.totalorder %s768_s24, %s544_s7  ;;  %p553_p3 = scmp.lt.s32.totalorder %s544_s7, %s544_s7 }
  0x26   : > { %p547_p10 = pnand %p545_p0, %p533_p9  ;;  %p554_p12 = por %p553_p3, %p552_p6 }
  0x28   : > { %p548_p8 = pneg %p547_p10 }
  0x2a   : > { %p555_p2 = pnand %p554_p12, %p548_p8 }
  0x2c   : > { %558 = shalt.err (!%p555_p2)
}
  0x2d   : > { %s678_s8 = smov 64   ;;  %s679_s15 = smov 4  }
  0x2e   : > { %458 = dma.hbm_to_vmem [thread:$0]  (!%p776_p5), %s928_s0, 128, %s768_s24, [#allocation3], %s678_s8, %s678_s8, %s679_s15  }
  0x2f   : > { %p36_p3 = scmp.ge.s32.totalorder %s34_s27, 2  ;;  %s75_s23 = sadd.s32 1, %s663_s11 }
  0x30   : > { %s157_s28 = sand.u32 1, %s663_s11   ;;  %s423_s3 = sshll.u32 %s671_s13, 6 }
  0x31   : > { %s958_s27 = smov (%p36_p3, %s34_s27), 0  ;;  %s422_s29 = sshll.u32 %s157_s28, 4 }
  0x32   : > { %s71_s30 = ssub.s32 %s671_s13, %s958_s27  ;;  %s821_s5 = scalar_lea.hbm %s929_s1, %s423_s3 }
  0x33   : > { %p73_p6 = scmp.eq.s32.totalorder %s71_s30, 0  ;;  %s161_s24 = scalar_lea.vmem [#allocation5], %s422_s29 }
  0x34   : > { %s170_s6 = sshll.u32 %s161_s24, 4  ;;  %s828_s16 = scalar_lea.sflag [#allocation6], %s157_s28  ;;  %s826_s6 = int_to_ptr.vmem [resolvable:$true] %s170_s6 }
  0x35   : > { %s824_s7 = scalar_select %p73_p6, %s663_s11, %s75_s23  }
  0x36   : > { %s559_s18 = scalar_lea.hbm %s821_s5, 256  ;;  %p945_p10 = scmp.ne.s32.totalorder %s944_s26, 0 }
  0x37   : > { %p560_p8 = scmp.ne.s32.totalorder %s821_s5, %s559_s18  ;;  %s564_s25 = scalar_lea.hbm %s929_s1, 512 }
  0x38   : > { %p561_p12 = pneg %p945_p10  ;;  %p565_p2 = scmp.lt.u32.totalorder %s821_s5, %s929_s1 }
  0x39   : > { %p566_p7 = scmp.lt.u32.totalorder %s564_s25, %s559_s18  ;;  %p568_p11 = scmp.lt.u32.totalorder %s559_s18, %s821_s5 }
  0x3a   : > { %p562_p0 = pnand %p561_p12, %p560_p8 }
  0x3b   : > { %p567_p9 = por %p566_p7, %p565_p2 }
  0x3c   : > { %p563_p5 = pneg %p562_p0 }
  0x3d   : > { %p569_p13 = por %p568_p11, %p567_p9 }
  0x3f   : > { %p570_p4 = pnand %p569_p13, %p563_p5 }
  0x41   : > { %573 = shalt.err (!%p570_p4)
}
  0x42   : > { %s574_s23 = scalar_lea.vmem %s826_s6, 256  ;;  %s680_s28 = smov [#allocation5]  }
  0x43   : > { %p575_p1 = scmp.ne.s32.totalorder %s826_s6, %s574_s23  ;;  %s579_s24 = sshll.u32 %s680_s28, 4  ;;  %s580_s24 = int_to_ptr.vmem [resolvable:$false] %s579_s24 }
  0x44   : > { %s581_s30 = scalar_lea.vmem %s580_s24, 512  ;;  %p582_p8 = scmp.lt.s32.totalorder %s826_s6, %s580_s24 }
  0x45   : > { %p577_p3 = pnand %p575_p1, %p561_p12  ;;  %p583_p0 = scmp.lt.s32.totalorder %s581_s30, %s574_s23 }
  0x47   : > { %p578_p6 = pneg %p577_p3  ;;  %p584_p2 = por %p583_p0, %p582_p8 }
  0x49   : > { %p585_p7 = pnand %p584_p2, %p578_p6 }
  0x4b   : > { %588 = shalt.err (!%p585_p7)
}
  0x4c   : > { %s681_s18 = smov 128   ;;  %p946_p12 = scmp.ne.s32.totalorder %s942_s22, 0 }
  0x4d   : > { %462 = dma.hbm_to_vmem [thread:$0]  (!%p945_p10), %s821_s5, 256, %s826_s6, %s828_s16, %s681_s18, %s678_s8, %s679_s15  }
  0x4e   : > { %182 = sbr.rel (%p946_p12) target bundleno = 329 (0x149), region = 28  ;;  %p947_p5 = scmp.ne.s32.totalorder (!%p946_p12), %s937_s17, 0 }
  0x55   : > { %642 = dma.done.wait (%p947_p5), [#allocation3], 128  }
  0x56   : > { %644 = vsyncadd (%p947_p5), [#allocation3], 4294967168  ;;  %s865_s3 = sand.u32 1, %s659_s10   ;;  %p948_p9 = scmp.ne.s32.totalorder %s939_s19, 0 }
  0x57   : > { %s426_s26 = sshll.u32 %s865_s3, 4  ;;  %s189_s25 = scalar_lea.sflag [#allocation6], %s865_s3 }
  0x58   : > { %s192_s29 = scalar_lea.vmem [#allocation5], %s426_s26 }
  0x59   : > { %646 = dma.done.wait (%p948_p9), %s189_s25, 256  }
  0x5a   : > { %648 = vsyncadd (%p948_p9), %s189_s25, 4294967040  ;;  %v682_v0 = vmov 0.0   ;;  %vm683_vm0 = vmmov 0   ;;  %v528_v1 = vld [vmem:[%s192_s29] sm:$0xff]   ;;  %v529_v2 = vld [vmem:[%s192_s29 + $0x8] sm:$0xff]   ;;  %vm248_vm1 = vcmask 261120  }
  0x5b   : > { %439 = vmatprep.subr.bf16.mxu0 %v682_v0  ;;  %443 = vmatprep.mubr.msk.bf16.mxu0 %vm683_vm0, %v682_v0  ;;  %v530_v3 = vld [vmem:[#allocation2] sm:$0xff]   ;;  %s433_s17 = sshll.u32 %s667_s12, 7  ;;  %s212_s22 = scalar_lea.vmem [#allocation7], %s426_s26 }
  0x5c   : > { %440 = vmatpush3.bf16.msra.mxu0 %v528_v1  ;;  %s313_s8 = sshll.u32 %s212_s22, 4  ;;  %s877_s5 = scalar_lea.hbm %s930_s2, %s433_s17  ;;  %s879_s8 = int_to_ptr.vmem [resolvable:$true] %s313_s8 }
  0x5d   : > { %441 = vmatprep.subr.bf16.mxu0 %v682_v0  ;;  %s298_s6 = scalar_lea.sflag [#allocation4], %s865_s3  ;;  %s589_s12 = scalar_lea.vmem %s879_s8, 256 }
  0x5e   : > { %p590_p10 = scmp.ne.s32.totalorder %s879_s8, %s589_s12  ;;  %p949_p11 = scmp.ne.s32.totalorder %s940_s20, 0 }
  0x5f   : > { %s684_s16 = smov [#allocation7]  }
  0x60   : > { %442 = vmatpush3.bf16.msra.mxu0 %v529_v2  ;;  %p591_p13 = pnand %p590_p10, %p949_p11  ;;  %s593_s4 = sshll.u32 %s684_s16, 4  ;;  %s594_s4 = int_to_ptr.vmem [resolvable:$false] %s593_s4 }
  0x61   : > { %s595_s23 = scalar_lea.vmem %s594_s4, 512  ;;  %p596_p1 = scmp.lt.s32.totalorder %s879_s8, %s594_s4 }
  0x62   : > { %p592_p4 = pneg %p591_p13  ;;  %p597_p3 = scmp.lt.s32.totalorder %s595_s23, %s589_s12 }
  0x63   : > { %444 = vmatmul.mubr.msk.bf16.vlgmr.msra.gmra.mrb[0].mxu0 %vm248_vm1, %v530_v3 }
  0x64   : > { %p598_p6 = por %p597_p3, %p596_p1 }
  0x66   : > { %p599_p8 = pnand %p598_p6, %p592_p4 }
 0x136   : > { %v286_v4 = vpop.f32.mrb[0].mxu0 }
 0x137   : > { %v445_v5 = vpop.f32.mrb[1].mxu0  ;;  %295 = vst [vmem:[%s212_s22] sm:$0xff] %v286_v4 }
 0x138   : > { %v289_v6 = vpop.f32.mrb[2].mxu0 }
 0x139   : > { %v446_v7 = vpop.f32.mrb[3].mxu0  ;;  %296 = vst [vmem:[%s212_s22 + $0x8] sm:$0xff] %v289_v6 }
 0x13a   : > { %602 = shalt.err (!%p599_p8)
}
 0x13b   : > { %s603_s28 = scalar_lea.hbm %s877_s5, 256  ;;  %s607_s18 = scalar_lea.hbm %s930_s2, 512 }
 0x13c   : > { %p604_p0 = scmp.ne.s32.totalorder %s877_s5, %s603_s28  ;;  %p608_p12 = scmp.lt.u32.totalorder %s877_s5, %s930_s2 }
 0x13d   : > { %p609_p5 = scmp.lt.u32.totalorder %s607_s18, %s603_s28  ;;  %p611_p10 = scmp.lt.u32.totalorder %s603_s28, %s877_s5 }
 0x13e   : > { %p605_p2 = pnand %p604_p0, %p949_p11 }
 0x13f   : > { %p610_p9 = por %p609_p5, %p608_p12 }
 0x140   : > { %p606_p7 = pneg %p605_p2 }
 0x141   : > { %p612_p13 = por %p611_p10, %p610_p9 }
 0x143   : > { %p613_p4 = pnand %p612_p13, %p606_p7 }
 0x145   : > { %616 = shalt.err (!%p613_p4)
}
 0x146   : > { %s685_s29 = smov 128   ;;  %s686_s17 = smov 256  }
 0x147   : > { %s687_s22 = smov 8  }
 0x148   : > { %453 = dma.vmem_to_hbm [thread:$0]  (%p949_p11), %s879_s8, 256, %s877_s5, %s298_s6, %s685_s29, %s686_s17, %s687_s22  }
 0x149 PF: > { %s328_s19 = sand.u32 1, %s655_s9   ;;  %p950_p1 = scmp.ne.s32.totalorder %s941_s21, 0 }
 0x14a   : > { %p951_p3 = scmp.ge.s32.totalorder %s675_s14, 2  ;;  %s329_s15 = scalar_lea.sflag [#allocation4], %s328_s19 }
 0x14c   : > { %p464_p6 = pnand %p951_p3, %p950_p1 }
 0x14e   : > { %650 = dma.done.wait (!%p464_p6), %s329_s15, 256  }
 0x14f   : > { %652 = vsyncadd (!%p464_p6), %s329_s15, 4294967040  ;;  %s19_s14 = sadd.s32 1, %s675_s14   ;;  %s952_s9 = smov %s659_s10 }
 0x150   : > { %p16_p8 = scmp.ge.s32.totalorder %s19_s14, 4   ;;  %s953_s10 = smov %s663_s11 }
 0x151   : > { %s954_s11 = smov %s824_s7  ;;  %s955_s12 = smov %s671_s13 }
 0x152   : > { %s956_s13 = smov %s958_s27  ;;  %18 = sbr.rel (!%p16_p8) target bundleno = 7 (0x7), region = 83 }
 0x159   :  { %334 = vsyncpa [#allocation3], 1 }
 0x15a   :  { %336 = vsyncpa [#allocation3 + $0x1], 1 }
 0x15b   :  { %337 = vsyncpa [#allocation6], 1 }
 0x15c   :  { %339 = vsyncpa [#allocation6 + $0x1], 1 }
 0x15d   :  { %340 = vsyncpa [#allocation4], 1 }
 0x15e   :  { %342 = vsyncpa [#allocation4 + $0x1], 1 }

</bundles_post_ra>
